<compile_context>
chip_gen: v7x
topology: tpu7x:2x2x1
jax: 0.10.0
libtpu: 0.0.40
codegen_flags: <defaults>
</compile_context>

<pallas_src>
import jax
import jax.numpy as jnp
from jax.experimental import pallas as pl
from jax.experimental.pallas import tpu as pltpu

IN_FEATURES = 30
HIDDEN = 30
OUT_FEATURES = 1
LANES = 128  # lane padding for hidden widths (weights/biases only; x stays 30-wide)


def _round_up(x, m):
    return ((x + m - 1) // m) * m


def mlp_kernel(x_ref,
               w1_ref, b1_ref,
               w2_ref, b2_ref,
               w3_ref, b3_ref,
               w4_ref, b4_ref,
               o_ref):
    # x_ref: (TB, 30) f32, streamed compact from HBM.
    # Hidden weights are zero-padded to 128 lanes (zero bias padding too), so the
    # padded hidden columns stay exactly 0 through Linear+ReLU and the math is
    # identical to the 30-wide model.
    x = x_ref[...].astype(jnp.bfloat16)                            # bf16 MXU operands
    h = jnp.dot(x, w1_ref[...], preferred_element_type=jnp.float32) + b1_ref[...]
    h = jnp.maximum(h, 0.0)                                        # (TB, 128) f32
    h = jnp.dot(h.astype(jnp.bfloat16), w2_ref[...],
                preferred_element_type=jnp.float32) + b2_ref[...]
    h = jnp.maximum(h, 0.0)
    h = jnp.dot(h.astype(jnp.bfloat16), w3_ref[...],
                preferred_element_type=jnp.float32) + b3_ref[...]
    h = jnp.maximum(h, 0.0)
    # Layer 4 has one real output column: VPU multiply with the broadcast w4 row
    # plus an XLU lane-sum (skips a full MXU pass), then sigmoid on that column only.
    logits = jnp.sum(h * w4_ref[...], axis=-1, keepdims=True) + b4_ref[...]   # (TB, 1)
    o_ref[...] = jax.nn.sigmoid(logits)


def service_model_forward(x, params, *, block_b=1024):
    """x: any shape (B, ...); flattened to (B, 30) like torch.nn.Flatten()."""
    B = x.shape[0]
    x2d = x.reshape(B, -1).astype(jnp.float32)
    assert x2d.shape[1] == IN_FEATURES, (
        f"expected {IN_FEATURES} features, got {x2d.shape[1]}")

    # Tiling: large tiles for HBM efficiency, but at least 2 balanced grid steps
    # when B allows so the "parallel" axis can shard across v7x's 2 TensorCores.
    n_steps = min(max(2, pl.cdiv(B, block_b)), pl.cdiv(B, 8))
    n_steps = max(n_steps, 1)
    TB = _round_up(pl.cdiv(B, n_steps), 8)
    Bp = TB * n_steps

    # Pad batch only; feature dim stays compact at 30.
    xp = jnp.pad(x2d, ((0, Bp - B), (0, 0)))

    (w1, b1), (w2, b2), (w3, b3), (w4, b4) = params

    def _pad2d(a, rows, cols):
        r, c = a.shape
        return jnp.pad(a.astype(jnp.float32), ((0, rows - r), (0, cols - c)))

    w1p = _pad2d(w1, IN_FEATURES, LANES).astype(jnp.bfloat16)    # (30, 128) bf16
    w2p = _pad2d(w2, LANES, LANES).astype(jnp.bfloat16)          # (128, 128) bf16
    w3p = _pad2d(w3, LANES, LANES).astype(jnp.bfloat16)          # (128, 128) bf16
    w4p = _pad2d(w4.reshape(1, HIDDEN), 1, LANES)                # (1, 128) f32 row
    b1p = _pad2d(b1.reshape(1, -1), 1, LANES)                    # (1, 128) f32
    b2p = _pad2d(b2.reshape(1, -1), 1, LANES)
    b3p = _pad2d(b3.reshape(1, -1), 1, LANES)
    b4p = b4.reshape(1, 1).astype(jnp.float32)                   # (1, 1) f32

    const2 = lambda i: (0, 0)
    out = pl.pallas_call(
        mlp_kernel,
        out_shape=jax.ShapeDtypeStruct((Bp, OUT_FEATURES), jnp.float32),
        grid=(n_steps,),
        in_specs=[pl.BlockSpec((TB, IN_FEATURES), lambda i: (i, 0)),   # streamed x
                  pl.BlockSpec((IN_FEATURES, LANES), const2),          # VMEM-resident
                  pl.BlockSpec((1, LANES), const2),
                  pl.BlockSpec((LANES, LANES), const2),
                  pl.BlockSpec((1, LANES), const2),
                  pl.BlockSpec((LANES, LANES), const2),
                  pl.BlockSpec((1, LANES), const2),
                  pl.BlockSpec((1, LANES), const2),
                  pl.BlockSpec((1, 1), const2)],
        out_specs=pl.BlockSpec((TB, OUT_FEATURES), lambda i: (i, 0)),
        compiler_params=pltpu.CompilerParams(
            dimension_semantics=("parallel",)),
    )(xp, w1p, b1p, w2p, b2p, w3p, b3p, w4p, b4p)

    return out[:B]   # (B, 1), padded batch rows dropped


def init_params(key):
    """Deterministic init; weights stored (in, out), biases (1, out) — y = x @ W + b
    matches torch.nn.Linear's y = x @ weight.T + bias."""
    dims = [(30, 30), (30, 30), (30, 30), (30, 1)]
    params = []
    for i, (d_in, d_out) in enumerate(dims):
        kw, kb = jax.random.split(jax.random.fold_in(key, i))
        bound = 1.0 / jnp.sqrt(d_in)  # torch.nn.Linear default init range
        w = jax.random.uniform(kw, (d_in, d_out), jnp.float32, -bound, bound)
        b = jax.random.uniform(kb, (1, d_out), jnp.float32, -bound, bound)
        params.append((w, b))
    return params


def reference_forward(x, params):
    B = x.shape[0]
    h = x.reshape(B, -1).astype(jnp.float32)
    (w1, b1), (w2, b2), (w3, b3), (w4, b4) = params
    h = jnp.maximum(h @ w1 + b1, 0.0)
    h = jnp.maximum(h @ w2 + b2, 0.0)
    h = jnp.maximum(h @ w3 + b3, 0.0)
    return jax.nn.sigmoid(h @ w4 + b4)


if __name__ == "__main__":
    key = jax.random.PRNGKey(0)
    kx, kp = jax.random.split(key)

    # Small example: batch=8, features arranged as (8, 5, 6) -> Flatten -> (8, 30)
    x = jax.random.normal(kx, (8, 5, 6), dtype=jnp.float32)
    params = init_params(kp)

    y = jax.block_until_ready(service_model_forward(x, params))
    y_ref = reference_forward(x, params)

    assert y.shape == (8, 1)
    err = float(jnp.max(jnp.abs(y - y_ref)))
    # bf16 matmuls vs f32 reference -> relaxed tolerance
    assert err < 2e-2, f"max abs err {err}"

    print("KERNEL_OK")
</pallas_src>

<mosaic_0001>
module attributes {stable_mosaic.version = 11 : i64} {
  func.func @mlp_kernel(%arg0: i32, %arg1: memref<8x30xf32, #tpu.memory_space<vmem>>, %arg2: memref<30x128xbf16, #tpu.memory_space<vmem>>, %arg3: memref<1x128xf32, #tpu.memory_space<vmem>>, %arg4: memref<128x128xbf16, #tpu.memory_space<vmem>>, %arg5: memref<1x128xf32, #tpu.memory_space<vmem>>, %arg6: memref<128x128xbf16, #tpu.memory_space<vmem>>, %arg7: memref<1x128xf32, #tpu.memory_space<vmem>>, %arg8: memref<1x128xf32, #tpu.memory_space<vmem>>, %arg9: memref<1x1xf32, #tpu.memory_space<vmem>>, %arg10: memref<8x1xf32, #tpu.memory_space<vmem>>) attributes {dimension_semantics = [#tpu.dimension_semantics<parallel>], iteration_bounds = array<i64: 1>, scalar_prefetch = 0 : i64, scratch_operands = 0 : i64, tpu.core_type = #tpu.core_type<tc>, window_params = [{transform_indices = @transform_0, window_bounds = array<i64: 8, 30>}, {pipeline_mode = #tpu.pipeline_mode<synchronous>, transform_indices = @transform_1, window_bounds = array<i64: 30, 128>}, {pipeline_mode = #tpu.pipeline_mode<synchronous>, transform_indices = @transform_2, window_bounds = array<i64: 1, 128>}, {pipeline_mode = #tpu.pipeline_mode<synchronous>, transform_indices = @transform_3, window_bounds = array<i64: 128, 128>}, {pipeline_mode = #tpu.pipeline_mode<synchronous>, transform_indices = @transform_4, window_bounds = array<i64: 1, 128>}, {pipeline_mode = #tpu.pipeline_mode<synchronous>, transform_indices = @transform_5, window_bounds = array<i64: 128, 128>}, {pipeline_mode = #tpu.pipeline_mode<synchronous>, transform_indices = @transform_6, window_bounds = array<i64: 1, 128>}, {pipeline_mode = #tpu.pipeline_mode<synchronous>, transform_indices = @transform_7, window_bounds = array<i64: 1, 128>}, {pipeline_mode = #tpu.pipeline_mode<synchronous>, transform_indices = @transform_8, window_bounds = array<i64: 1, 1>}, {transform_indices = @transform_9, window_bounds = array<i64: 8, 1>}]} {
    %c0 = arith.constant 0 : index
    %c0_0 = arith.constant 0 : index
    %0 = vector.load %arg1[%c0, %c0_0] : memref<8x30xf32, #tpu.memory_space<vmem>>, vector<8x30xf32>
    %1 = arith.truncf %0 : vector<8x30xf32> to vector<8x30xbf16>
    %c0_1 = arith.constant 0 : index
    %c0_2 = arith.constant 0 : index
    %2 = vector.load %arg2[%c0_1, %c0_2] : memref<30x128xbf16, #tpu.memory_space<vmem>>, vector<30x128xbf16>
    %cst = arith.constant dense<0.000000e+00> : vector<8x128xf32>
    %3 = tpu.matmul %1, %2, %cst {dimension_numbers = #tpu.dot_dimension_numbers<[1], [0], [0], [1], [0, 0, 1, 1], [], []>} : vector<8x30xbf16>, vector<30x128xbf16>, vector<8x128xf32> -> vector<8x128xf32>
    %c0_3 = arith.constant 0 : index
    %c0_4 = arith.constant 0 : index
    %4 = vector.load %arg3[%c0_3, %c0_4] : memref<1x128xf32, #tpu.memory_space<vmem>>, vector<1x128xf32>
    %5 = vector.broadcast %4 : vector<1x128xf32> to vector<8x128xf32>
    %6 = arith.addf %3, %5 : vector<8x128xf32>
    %cst_5 = arith.constant 0.000000e+00 : f32
    %7 = vector.broadcast %cst_5 : f32 to vector<8x128xf32>
    %8 = arith.maximumf %6, %7 : vector<8x128xf32>
    %9 = arith.truncf %8 : vector<8x128xf32> to vector<8x128xbf16>
    %c0_6 = arith.constant 0 : index
    %c0_7 = arith.constant 0 : index
    %10 = vector.load %arg4[%c0_6, %c0_7] : memref<128x128xbf16, #tpu.memory_space<vmem>>, vector<128x128xbf16>
    %cst_8 = arith.constant dense<0.000000e+00> : vector<8x128xf32>
    %11 = tpu.matmul %9, %10, %cst_8 {dimension_numbers = #tpu.dot_dimension_numbers<[1], [0], [0], [1], [0, 0, 1, 1], [], []>} : vector<8x128xbf16>, vector<128x128xbf16>, vector<8x128xf32> -> vector<8x128xf32>
    %c0_9 = arith.constant 0 : index
    %c0_10 = arith.constant 0 : index
    %12 = vector.load %arg5[%c0_9, %c0_10] : memref<1x128xf32, #tpu.memory_space<vmem>>, vector<1x128xf32>
    %13 = vector.broadcast %12 : vector<1x128xf32> to vector<8x128xf32>
    %14 = arith.addf %11, %13 : vector<8x128xf32>
    %cst_11 = arith.constant 0.000000e+00 : f32
    %15 = vector.broadcast %cst_11 : f32 to vector<8x128xf32>
    %16 = arith.maximumf %14, %15 : vector<8x128xf32>
    %17 = arith.truncf %16 : vector<8x128xf32> to vector<8x128xbf16>
    %c0_12 = arith.constant 0 : index
    %c0_13 = arith.constant 0 : index
    %18 = vector.load %arg6[%c0_12, %c0_13] : memref<128x128xbf16, #tpu.memory_space<vmem>>, vector<128x128xbf16>
    %cst_14 = arith.constant dense<0.000000e+00> : vector<8x128xf32>
    %19 = tpu.matmul %17, %18, %cst_14 {dimension_numbers = #tpu.dot_dimension_numbers<[1], [0], [0], [1], [0, 0, 1, 1], [], []>} : vector<8x128xbf16>, vector<128x128xbf16>, vector<8x128xf32> -> vector<8x128xf32>
    %c0_15 = arith.constant 0 : index
    %c0_16 = arith.constant 0 : index
    %20 = vector.load %arg7[%c0_15, %c0_16] : memref<1x128xf32, #tpu.memory_space<vmem>>, vector<1x128xf32>
    %21 = vector.broadcast %20 : vector<1x128xf32> to vector<8x128xf32>
    %22 = arith.addf %19, %21 : vector<8x128xf32>
    %cst_17 = arith.constant 0.000000e+00 : f32
    %23 = vector.broadcast %cst_17 : f32 to vector<8x128xf32>
    %24 = arith.maximumf %22, %23 : vector<8x128xf32>
    %c0_18 = arith.constant 0 : index
    %c0_19 = arith.constant 0 : index
    %25 = vector.load %arg8[%c0_18, %c0_19] : memref<1x128xf32, #tpu.memory_space<vmem>>, vector<1x128xf32>
    %26 = vector.broadcast %25 : vector<1x128xf32> to vector<8x128xf32>
    %27 = arith.mulf %24, %26 : vector<8x128xf32>
    %cst_20 = arith.constant dense<0.000000e+00> : vector<8xf32>
    %28 = vector.multi_reduction <add>, %27, %cst_20 [1] : vector<8x128xf32> to vector<8xf32>
    %29 = vector.shape_cast %28 : vector<8xf32> to vector<8x1xf32>
    %c0_21 = arith.constant 0 : index
    %c0_22 = arith.constant 0 : index
    %30 = vector.load %arg9[%c0_21, %c0_22] : memref<1x1xf32, #tpu.memory_space<vmem>>, vector<1x1xf32>
    %31 = vector.broadcast %30 : vector<1x1xf32> to vector<8x1xf32>
    %32 = arith.addf %29, %31 : vector<8x1xf32>
    %33 = arith.negf %32 : vector<8x1xf32>
    %34 = math.exp %33 : vector<8x1xf32>
    %cst_23 = arith.constant 1.000000e+00 : f32
    %35 = vector.broadcast %cst_23 : f32 to vector<8x1xf32>
    %36 = arith.addf %35, %34 : vector<8x1xf32>
    %37 = arith.divf %35, %36 : vector<8x1xf32>
    %c0_24 = arith.constant 0 : index
    %c0_25 = arith.constant 0 : index
    %38 = vector.load %arg10[%c0_24, %c0_25] : memref<8x1xf32, #tpu.memory_space<vmem>>, vector<8x1xf32>
    tpu.vector_store %arg10[%c0_24, %c0_25], %37 {strides = array<i32>} : memref<8x1xf32, #tpu.memory_space<vmem>>, vector<8x1xf32>,
    return
  }
  func.func @transform_0(%arg0: i32) -> (i32, i32) {
    %c0_i32 = arith.constant 0 : i32
    %c0_i32_0 = arith.constant 0 : i32
    return %arg0, %c0_i32 : i32, i32
  }
  func.func @transform_1(%arg0: i32) -> (i32, i32) {
    %c0_i32 = arith.constant 0 : i32
    %c0_i32_0 = arith.constant 0 : i32
    %c0_i32_1 = arith.constant 0 : i32
    return %c0_i32, %c0_i32_0 : i32, i32
  }
  func.func @transform_2(%arg0: i32) -> (i32, i32) {
    %c0_i32 = arith.constant 0 : i32
    %c0_i32_0 = arith.constant 0 : i32
    %c0_i32_1 = arith.constant 0 : i32
    return %c0_i32, %c0_i32_0 : i32, i32
  }
  func.func @transform_3(%arg0: i32) -> (i32, i32) {
    %c0_i32 = arith.constant 0 : i32
    %c0_i32_0 = arith.constant 0 : i32
    %c0_i32_1 = arith.constant 0 : i32
    return %c0_i32, %c0_i32_0 : i32, i32
  }
  func.func @transform_4(%arg0: i32) -> (i32, i32) {
    %c0_i32 = arith.constant 0 : i32
    %c0_i32_0 = arith.constant 0 : i32
    %c0_i32_1 = arith.constant 0 : i32
    return %c0_i32, %c0_i32_0 : i32, i32
  }
  func.func @transform_5(%arg0: i32) -> (i32, i32) {
    %c0_i32 = arith.constant 0 : i32
    %c0_i32_0 = arith.constant 0 : i32
    %c0_i32_1 = arith.constant 0 : i32
    return %c0_i32, %c0_i32_0 : i32, i32
  }
  func.func @transform_6(%arg0: i32) -> (i32, i32) {
    %c0_i32 = arith.constant 0 : i32
    %c0_i32_0 = arith.constant 0 : i32
    %c0_i32_1 = arith.constant 0 : i32
    return %c0_i32, %c0_i32_0 : i32, i32
  }
  func.func @transform_7(%arg0: i32) -> (i32, i32) {
    %c0_i32 = arith.constant 0 : i32
    %c0_i32_0 = arith.constant 0 : i32
    %c0_i32_1 = arith.constant 0 : i32
    return %c0_i32, %c0_i32_0 : i32, i32
  }
  func.func @transform_8(%arg0: i32) -> (i32, i32) {
    %c0_i32 = arith.constant 0 : i32
    %c0_i32_0 = arith.constant 0 : i32
    %c0_i32_1 = arith.constant 0 : i32
    return %c0_i32, %c0_i32_0 : i32, i32
  }
  func.func @transform_9(%arg0: i32) -> (i32, i32) {
    %c0_i32 = arith.constant 0 : i32
    %c0_i32_0 = arith.constant 0 : i32
    return %arg0, %c0_i32 : i32, i32
  }
}

</mosaic_0001>

<bundles_post_ra>
// kernel: tpu_custom_call.1
= control target key start
LH: loop header
LB: loop body
LE: loop exit
PB: predicated region body
PF: predicated region fallthrough
CT: control target
= control target key end

     0   :  { %s795_s0 = inlined_call_operand.hbm [shape: f32[8,30], index: 0, kind: input, shape index: {}]   ;;  %s796_s1 = inlined_call_operand.hbm [shape: bf16[30,128], index: 1, kind: input, shape index: {}]   ;;  %s797_s2 = inlined_call_operand.vmem [shape: f32[1,128], index: 2, kind: input, shape index: {}]   ;;  %s798_s3 = inlined_call_operand.hbm [shape: bf16[128,128], index: 3, kind: input, shape index: {}]   ;;  %s799_s4 = inlined_call_operand.vmem [shape: f32[1,128], index: 4, kind: input, shape index: {}]   ;;  %s800_s5 = inlined_call_operand.hbm [shape: bf16[128,128], index: 5, kind: input, shape index: {}]   ;;  %s801_s6 = inlined_call_operand.vmem [shape: f32[1,128], index: 6, kind: input, shape index: {}]   ;;  %s802_s7 = inlined_call_operand.vmem [shape: f32[1,128], index: 7, kind: input, shape index: {}]   ;;  %s803_s8 = inlined_call_operand.<no memory space> [shape: f32[1,1], index: 8, kind: input, shape index: {}]   ;;  %s804_s9 = inlined_call_operand.vmem [shape: f32[8,1], index: 9, kind: output, shape index: {}]  }
   0x1   :  { %v14_v0 = vstv %s803_s8 }
   0x2   :  { %15 = vst [vmem:[#allocation2] sm:$0x1] %v14_v0 }
   0x3   :  { %16 = vsyncpa [#allocation4], 0 }
   0x4   :  { %17 = vsyncpa [#allocation6], 0 }
   0x5   :  { %18 = vsyncpa [#allocation9], 0  ;;  %s638_s11 = smov [#allocation5]   ;;  %s544_s15 = scalar_lea.hbm %s796_s1, 256 }
   0x6   :  { %s34_s12 = sshll.u32 %s638_s11, 4  ;;  %p545_p0 = scmp.ne.s32.totalorder %s796_s1, %s544_s15  ;;  %s35_s12 = int_to_ptr.vmem [resolvable:$true] %s34_s12 }
   0x7   :  { %p548_p1 = scmp.lt.u32.totalorder %s544_s15, %s796_s1 }
   0x9   :  { %p550_p2 = pnand %p548_p1, %p545_p0 }
   0xb   :  { %553 = shalt.err (!%p550_p2)
}
   0xc   :  { %s554_s8 = scalar_lea.vmem %s35_s12, 256  ;;  %p559_p4 = scmp.lt.s32.totalorder %s35_s12, %s35_s12 }
   0xd   :  { %p555_p3 = scmp.ne.s32.totalorder %s35_s12, %s554_s8  ;;  %p560_p5 = scmp.lt.s32.totalorder %s554_s8, %s554_s8 }
   0xf   :  { %p561_p6 = por %p560_p5, %p559_p4 }
  0x11   :  { %p562_p7 = pnand %p561_p6, %p555_p3 }
  0x13   :  { %565 = shalt.err (!%p562_p7)
}
  0x14   :  { %s639_s20 = smov 64   ;;  %s640_s21 = smov 4  }
  0x15   :  { %40 = dma.hbm_to_vmem [thread:$0]  %s796_s1, 256, %s35_s12, [#allocation6], %s639_s20, %s639_s20, %s640_s21  }
  0x16   :  { %s641_s24 = smov [#allocation3]   ;;  %s642_s26 = smov [#allocation7]  }
  0x17   :  { %s25_s25 = sshll.u32 %s641_s24, 4  ;;  %s48_s27 = sshll.u32 %s642_s26, 4  ;;  %s26_s25 = int_to_ptr.vmem [resolvable:$true] %s25_s25  ;;  %s49_s27 = int_to_ptr.vmem [resolvable:$true] %s48_s27 }
  0x18   :  { %s566_s30 = scalar_lea.hbm %s795_s0, 128 }
  0x19   :  { %p567_p8 = scmp.ne.s32.totalorder %s795_s0, %s566_s30  ;;  %p570_p9 = scmp.lt.u32.totalorder %s566_s30, %s795_s0 }
  0x1b   :  { %p572_p10 = pnand %p570_p9, %p567_p8 }
  0x1d   :  { %575 = shalt.err (!%p572_p10)
}
  0x1e   :  { %s576_s1 = scalar_lea.vmem %s26_s25, 128  ;;  %p581_p12 = scmp.lt.s32.totalorder %s26_s25, %s26_s25 }
  0x1f   :  { %p577_p11 = scmp.ne.s32.totalorder %s26_s25, %s576_s1  ;;  %p582_p13 = scmp.lt.s32.totalorder %s576_s1, %s576_s1 }
  0x21   :  { %p583_p0 = por %p582_p13, %p581_p12 }
  0x23   :  { %p584_p1 = pnand %p583_p0, %p577_p11 }
  0x25   :  { %587 = shalt.err (!%p584_p1)
}
  0x26   :  { %28 = dma.hbm_to_vmem [thread:$0]  %s795_s0, 128, %s26_s25, [#allocation4]  }
  0x27   :  { %s588_s18 = scalar_lea.hbm %s798_s3, 1024 }
  0x28   :  { %p589_p2 = scmp.ne.s32.totalorder %s798_s3, %s588_s18  ;;  %p592_p3 = scmp.lt.u32.totalorder %s588_s18, %s798_s3 }
  0x2a   :  { %p594_p4 = pnand %p592_p3, %p589_p2 }
  0x2c   :  { %597 = shalt.err (!%p594_p4)
}
  0x2d   :  { %s598_s24 = scalar_lea.vmem %s49_s27, 1024  ;;  %p603_p6 = scmp.lt.s32.totalorder %s49_s27, %s49_s27 }
  0x2e   :  { %p599_p5 = scmp.ne.s32.totalorder %s49_s27, %s598_s24  ;;  %p604_p7 = scmp.lt.s32.totalorder %s598_s24, %s598_s24 }
  0x30   :  { %p605_p8 = por %p604_p7, %p603_p6 }
  0x32   :  { %p606_p9 = pnand %p605_p8, %p599_p5 }
  0x34   :  { %609 = shalt.err (!%p606_p9)
}
  0x35   :  { %54 = dma.hbm_to_vmem [thread:$0]  %s798_s3, 1024, %s49_s27, [#allocation6], %s639_s20, %s639_s20, %s640_s21  }
  0x36   :  { %s643_s26 = smov [#allocation8]   ;;  %s610_s10 = scalar_lea.hbm %s800_s5, 1024 }
  0x37   :  { %s62_s28 = sshll.u32 %s643_s26, 4  ;;  %p611_p10 = scmp.ne.s32.totalorder %s800_s5, %s610_s10  ;;  %s63_s28 = int_to_ptr.vmem [resolvable:$true] %s62_s28 }
  0x38   :  { %p614_p11 = scmp.lt.u32.totalorder %s610_s10, %s800_s5 }
  0x3a   :  { %p616_p12 = pnand %p614_p11, %p611_p10 }
  0x3c   :  { %619 = shalt.err (!%p616_p12)
}
  0x3d   :  { %s620_s12 = scalar_lea.vmem %s63_s28, 1024  ;;  %p625_p0 = scmp.lt.s32.totalorder %s63_s28, %s63_s28 }
  0x3e   :  { %p621_p13 = scmp.ne.s32.totalorder %s63_s28, %s620_s12  ;;  %p626_p1 = scmp.lt.s32.totalorder %s620_s12, %s620_s12 }
  0x40   :  { %p627_p2 = por %p626_p1, %p625_p0 }
  0x42   :  { %p628_p3 = pnand %p627_p2, %p621_p13 }
  0x44   :  { %631 = shalt.err (!%p628_p3)
}
  0x45   :  { %68 = dma.hbm_to_vmem [thread:$0]  %s800_s5, 1024, %s63_s28, [#allocation9], %s639_s20, %s639_s20, %s640_s21  }
  0x46   :  { %632 = dma.done.wait [#allocation4], 128  }
  0x47   :  { %633 = vsyncadd [#allocation4], 4294967168 }
  0x48   :  { %634 = dma.done.wait [#allocation6], 1280  }
  0x49   :  { %635 = vsyncadd [#allocation6], 4294966016 }
  0x4a   :  { %636 = dma.done.wait [#allocation9], 1024  }
  0x4b   :  { %637 = vsyncadd [#allocation9], 4294966272  ;;  %v644_v1 = vmov 0.0   ;;  %vm645_vm0 = vmmov 0   ;;  %v522_v2 = vld [vmem:[#allocation5] sm:$0xff]   ;;  %vm116_vm1 = vcmask 1046528  }
  0x4c   :  { %466 = vmatprep.subr.bf16.mxu0 %v644_v1  ;;  %470 = vmatprep.mubr.msk.bf16.mxu0 %vm645_vm0, %v644_v1  ;;  %v523_v3 = vld [vmem:[#allocation5 + $0x8] sm:$0x7f]   ;;  %v88_v4 = vld [vmem:[#allocation3] sm:$0xff]  ;;  %v524_v6 = vld [vmem:[#allocation7] sm:$0xff]   ;;  %vm112_vm2 = vcmask 244736   ;;  %vm411_vm3 = vcmask 7168  }
  0x4d   :  { %474 = vmatprep.subr.bf16.mxu1 %v644_v1  ;;  %490 = vmatprep.mubr.msk.bf16.mxu1 %vm645_vm0, %v644_v1  ;;  %v118_v5 = vsel %vm116_vm1, %v523_v3, 0  ;;  %v89_v7 = vpack.c.bf16 %v88_v4, %v88_v4  ;;  %v525_v8 = vld [vmem:[#allocation7 + $0x8] sm:$0xff]   ;;  %v526_v9 = vld [vmem:[#allocation7 + $0x10] sm:$0xff]   ;;  %v527_v10 = vld [vmem:[#allocation7 + $0x18] sm:$0xff]  }
  0x4e   :  { %467 = vmatpush3.bf16.msra.mxu0 %v522_v2  ;;  %475 = vmatpush3.bf16.msra.mxu1 %v524_v6  ;;  %v528_v11 = vld [vmem:[#allocation7 + $0x20] sm:$0xff]   ;;  %v529_v12 = vld [vmem:[#allocation7 + $0x28] sm:$0xff]   ;;  %v530_v13 = vld [vmem:[#allocation7 + $0x30] sm:$0xff]  }
  0x4f   :  { %468 = vmatprep.subr.bf16.mxu0 %v644_v1  ;;  %476 = vmatprep.subr.bf16.mxu1 %v644_v1  ;;  %v531_v14 = vld [vmem:[#allocation7 + $0x38] sm:$0xff]   ;;  %v532_v15 = vld [vmem:[#allocation8] sm:$0xff]   ;;  %v533_v16 = vld [vmem:[#allocation8 + $0x8] sm:$0xff]  }
  0x50   :  { %v534_v17 = vld [vmem:[#allocation8 + $0x10] sm:$0xff]   ;;  %v535_v18 = vld [vmem:[#allocation8 + $0x18] sm:$0xff]   ;;  %v536_v19 = vld [vmem:[#allocation8 + $0x20] sm:$0xff]  }
  0x51   :  { %v537_v20 = vld [vmem:[#allocation8 + $0x28] sm:$0xff]   ;;  %v420_v21 = vld [vmem:[%s797_s2] ss:$0 sm:$0xff]  ;;  %v538_v29 = vld [vmem:[#allocation8 + $0x30] sm:$0xff]  }
  0x52   :  { %469 = vmatpush3.bf16.msra.mxu0 %v118_v5  ;;  %477 = vmatpush3.bf16.msra.mxu1 %v525_v8  ;;  %v539_v30 = vld [vmem:[#allocation8 + $0x38] sm:$0xff]   ;;  %v424_v31 = vld [vmem:[%s799_s4] ss:$0 sm:$0xff] }
  0x53   :  { %494 = vmatprep.subr.bf16.mxu0 %v644_v1  ;;  %478 = vmatprep.subr.bf16.mxu1 %v644_v1  ;;  %v433_v39 = vld [vmem:[%s801_s6] ss:$0 sm:$0xff] }
  0x54   :  { %v442_v44 = vld [vmem:[%s802_s7] ss:$0 sm:$0xff] }
  0x55   :  { %471 = vmatmul.mubr.msk.bf16.vlgmr.msra.gmra.mrb[0].mxu0 %vm112_vm2, %v89_v7  ;;  %v443_v48 = vld [vmem:[#allocation2] ss:$0 sm:$0xff] }
  0x56   :  { %510 = vmatprep.mubr.msk.bf16.mxu0 %vm645_vm0, %v644_v1  ;;  %479 = vmatpush3.bf16.msra.mxu1 %v526_v9 }
  0x57   :  { %480 = vmatprep.subr.bf16.mxu1 %v644_v1  ;;  %495 = vmatpush3.bf16.msra.mxu0 %v532_v15 }
  0x58   :  { %496 = vmatprep.subr.bf16.mxu0 %v644_v1 }
  0x5a   :  { %481 = vmatpush3.bf16.msra.mxu1 %v527_v10 }
  0x5b   :  { %482 = vmatprep.subr.bf16.mxu1 %v644_v1  ;;  %497 = vmatpush3.bf16.msra.mxu0 %v533_v16 }
  0x5c   :  { %498 = vmatprep.subr.bf16.mxu0 %v644_v1 }
  0x5e   :  { %483 = vmatpush3.bf16.msra.mxu1 %v528_v11 }
  0x5f   :  { %484 = vmatprep.subr.bf16.mxu1 %v644_v1  ;;  %499 = vmatpush3.bf16.msra.mxu0 %v534_v17 }
  0x60   :  { %500 = vmatprep.subr.bf16.mxu0 %v644_v1 }
  0x62   :  { %485 = vmatpush3.bf16.msra.mxu1 %v529_v12 }
  0x63   :  { %486 = vmatprep.subr.bf16.mxu1 %v644_v1  ;;  %501 = vmatpush3.bf16.msra.mxu0 %v535_v18 }
  0x64   :  { %502 = vmatprep.subr.bf16.mxu0 %v644_v1 }
  0x66   :  { %487 = vmatpush3.bf16.msra.mxu1 %v530_v13 }
  0x67   :  { %488 = vmatprep.subr.bf16.mxu1 %v644_v1  ;;  %503 = vmatpush3.bf16.msra.mxu0 %v536_v19 }
  0x68   :  { %504 = vmatprep.subr.bf16.mxu0 %v644_v1 }
  0x6a   :  { %489 = vmatpush3.bf16.msra.mxu1 %v531_v14 }
  0x6b   :  { %505 = vmatpush3.bf16.msra.mxu0 %v537_v20 }
  0x6c   :  { %506 = vmatprep.subr.bf16.mxu0 %v644_v1 }
  0x6f   :  { %507 = vmatpush3.bf16.msra.mxu0 %v538_v29 }
  0x70   :  { %508 = vmatprep.subr.bf16.mxu0 %v644_v1 }
  0x73   :  { %509 = vmatpush3.bf16.msra.mxu0 %v539_v30 }
 0x128   :  { %v154_v22 = vpop.f32.mrb[0].mxu0 }
 0x129   :  { %v155_v23 = vadd.f32 %v420_v21, %v154_v22  ;;  %v472_v24 = vpop.f32.mrb[1].mxu0 }
 0x12a   :  { %v157_v25 = vpop.f32.mrb[2].mxu0 }
 0x12b   :  { %v160_v26 = vmax.f32 %v155_v23, 0.0  ;;  %v473_v27 = vpop.f32.mrb[3].mxu0 }
 0x12d   :  { %v161_v28 = vpack.c.bf16 %v160_v26, %v160_v26 }
 0x12f   :  { %491 = vmatmul.mubr.bf16.vlgmr.msra.gmra.mrb[0].mxu1 %v161_v28 }
 0x202   :  { %v267_v32 = vpop.f32.mrb[0].mxu1 }
 0x203   :  { %v268_v33 = vadd.f32 %v424_v31, %v267_v32  ;;  %v492_v34 = vpop.f32.mrb[1].mxu1 }
 0x204   :  { %v270_v35 = vpop.f32.mrb[2].mxu1 }
 0x205   :  { %v273_v36 = vmax.f32 %v268_v33, 0.0  ;;  %v493_v37 = vpop.f32.mrb[3].mxu1 }
 0x207   :  { %v274_v38 = vpack.c.bf16 %v273_v36, %v273_v36 }
 0x209   :  { %511 = vmatmul.mubr.bf16.vlgmr.msra.gmra.mrb[4].mxu0 %v274_v38 }
 0x2dc   :  { %v380_v40 = vpop.f32.mrb[4].mxu0 }
 0x2dd   :  { %v381_v41 = vadd.f32 %v433_v39, %v380_v40  ;;  %v512_v42 = vpop.f32.mrb[5].mxu0 }
 0x2de   :  { %v383_v43 = vpop.f32.mrb[6].mxu0 }
 0x2df   :  { %v386_v45 = vmax.f32 %v381_v41, 0.0  ;;  %v513_v46 = vpop.f32.mrb[7].mxu0 }
 0x2e1   :  { %v394_v47 = vmul.f32 %v442_v44, %v386_v45 }
 0x2e3   :  { %395 = vadd.xlane.f32.xlu0 %v394_v47 }
 0x370   :  { %v396_v49 = vpop.xlane.xlu0 %395 }
 0x371   :  { %v404_v50 = vadd.f32 %v443_v48, %v396_v49 }
 0x373   :  { %v444_v51 = vmul.f32 -1.442695, %v404_v50 }
 0x375   :  { %540 = vpow2.f32 %v444_v51 }
 0x37f   :  { %v541_v52 = vpop.eup %540 }
 0x380   :  { %v408_v53 = vadd.f32 1.0, %v541_v52 }
 0x382   :  { %542 = vrcp.f32 %v408_v53 }
 0x38c   :  { %v543_v54 = vpop.eup %542 }
 0x38d   :  { %412 = vst.msk [vmem:[%s804_s9] sm:$0xff] %vm411_vm3, %v543_v54 }
 0x38e   :  { %417 = vsyncpa [#allocation4], 1 }
 0x38f   :  { %418 = vsyncpa [#allocation6], 1 }
 0x390   :  { %419 = vsyncpa [#allocation9], 1 }

</bundles_post_ra>
